<compile_context>
chip_gen: v6e
topology: v6e:2x2x1
jax: 0.10.0
libtpu: 0.0.40
codegen_flags: <defaults>
</compile_context>

<pallas_src>
import jax
import jax.numpy as jnp
from jax.experimental import pallas as pl
from jax.experimental.pallas import tpu as pltpu


def level_model_kernel(z_ref, w1_ref, b1_ref, w2r_ref, b2r_ref, out_ref):
    # level_dense1 + ReLU (bias add / ReLU in f32; v5e VPU has no bf16 path).
    h1 = jnp.dot(z_ref[...], w1_ref[...], preferred_element_type=jnp.float32)
    h1 = jnp.maximum(h1 + b1_ref[...], 0.0)                           # (tm, F) f32
    # level_dense2 against the seq_len-replicated weights: one full-lane MXU matmul
    # producing the (tm, seq_len*F) slab directly (no in-kernel tile/concat).
    slab = jnp.dot(h1, w2r_ref[...], preferred_element_type=jnp.float32) + b2r_ref[...]
    out_ref[...] = slab.astype(out_ref.dtype)


def _round_up(x, m):
    return (x + m - 1) // m * m


def _select_batch_tile(B, L, slab_w, block_b, vmem_budget_bytes):
    """Pick rows/step: big (HBM-write bound), multiple of 8, VMEM-safe, >=2 grid steps."""
    if B <= 8:
        return B  # block equals full batch dim -> always a legal block shape
    bytes_per_row = 4 * (slab_w + L)                   # f32 out row + z row
    vmem_rows = (vmem_budget_bytes // (2 * bytes_per_row)) // 8 * 8   # double-buffered
    tm = max(8, min(block_b, vmem_rows))
    # Keep at least 2 grid steps so v7x's two TensorCores each drive their own HBM path.
    tm = min(tm, _round_up(pl.cdiv(B, 2), 8))
    tm = min(tm, _round_up(B, 8))
    return max(8, tm)


def level_model_forward(z, w1, b1, w2, b2, seq_len, *,
                        block_b=2048,
                        vmem_budget_bytes=32 << 20,
                        out_dtype=jnp.float32):
    B, L = z.shape
    F = w1.shape[1]
    slab_w = seq_len * F

    z = z.astype(jnp.float32)
    w1 = w1.astype(jnp.float32)
    b1 = b1.astype(jnp.float32)
    # Pre-replicate layer 2 across the sequence axis (32 KiB resident VMEM at F=32,S=8).
    w2_rep = jnp.tile(w2.astype(jnp.float32), (1, seq_len))    # (F, seq_len*F)
    b2_rep = jnp.tile(b2.astype(jnp.float32), (1, seq_len))    # (1, seq_len*F)

    tm = _select_batch_tile(B, L, slab_w, block_b, vmem_budget_bytes)
    grid = (pl.cdiv(B, tm),)

    # Explicit scoped-VMEM limit sized from the double-buffered tiles + resident weights,
    # kept well under v7x's 64 MiB physical VMEM.
    weight_bytes = 4 * (L * F + F + F * slab_w + slab_w)
    vmem_need = 2 * tm * 4 * (slab_w + L) + weight_bytes
    vmem_limit = max(16 << 20, min(_round_up(vmem_need, 1 << 20) + (4 << 20), 48 << 20))

    out_slab = pl.pallas_call(
        level_model_kernel,
        out_shape=jax.ShapeDtypeStruct((B, slab_w), out_dtype),
        grid_spec=pltpu.PrefetchScalarGridSpec(
            num_scalar_prefetch=0,
            grid=grid,
            in_specs=[
                pl.BlockSpec((tm, L), lambda i: (i, 0)),        # z: streamed per batch tile
                pl.BlockSpec((L, F), lambda i: (0, 0)),         # w1: VMEM-resident
                pl.BlockSpec((1, F), lambda i: (0, 0)),         # b1: VMEM-resident
                pl.BlockSpec((F, slab_w), lambda i: (0, 0)),    # w2_rep: VMEM-resident
                pl.BlockSpec((1, slab_w), lambda i: (0, 0)),    # b2_rep: VMEM-resident
            ],
            out_specs=pl.BlockSpec((tm, slab_w), lambda i: (i, 0)),
        ),
        compiler_params=pltpu.CompilerParams(
            dimension_semantics=("parallel",),   # batch axis shards across v7x's 2 TCs
            vmem_limit_bytes=vmem_limit,
        ),
    )(z, w1, b1, w2_rep, b2_rep)

    # Free contiguous view; matches level_params.view(-1, 1, F) * ones(1, S, 1).
    return out_slab.reshape(B, seq_len, F)


def init_params(key, latent_dim, feat_dim):
    """Deterministic synthetic parameters (shapes match nn.Linear in the module)."""
    k1, k2, k3, k4 = jax.random.split(key, 4)
    w1 = jax.random.normal(k1, (latent_dim, feat_dim), jnp.float32) * 0.1
    b1 = jax.random.normal(k2, (1, feat_dim), jnp.float32) * 0.1
    w2 = jax.random.normal(k3, (feat_dim, feat_dim), jnp.float32) * 0.1
    b2 = jax.random.normal(k4, (1, feat_dim), jnp.float32) * 0.1
    return w1, b1, w2, b2


def reference_forward(z, w1, b1, w2, b2, seq_len):
    """Pure-JAX reference mirroring the PyTorch forward."""
    h1 = jnp.maximum(z @ w1 + b1, 0.0)
    h2 = h1 @ w2 + b2
    level_params = h2.reshape(-1, 1, h2.shape[-1])
    ones_tensor = jnp.ones((1, seq_len, 1), jnp.float32)
    return level_params * ones_tensor


if __name__ == "__main__":
    latent_dim = 16
    feat_dim = 32
    seq_len = 8

    key = jax.random.PRNGKey(0)
    kz, kp = jax.random.split(key)
    w1, b1, w2, b2 = init_params(kp, latent_dim, feat_dim)

    # Small shape consistent with the module: batch=2.
    batch = 2
    z = jax.random.normal(kz, (batch, latent_dim), jnp.float32)
    out = jax.block_until_ready(level_model_forward(z, w1, b1, w2, b2, seq_len))
    ref = reference_forward(z, w1, b1, w2, b2, seq_len)
    assert out.shape == (batch, seq_len, feat_dim)
    assert jnp.allclose(out, ref, atol=1e-5, rtol=1e-5)

    # Large batch: exercises the enlarged tile and >=2 grid steps (tm=1024, grid=2).
    big_b = 2048
    zb = jax.random.normal(jax.random.PRNGKey(1), (big_b, latent_dim), jnp.float32)
    out_b = jax.block_until_ready(level_model_forward(zb, w1, b1, w2, b2, seq_len))
    ref_b = reference_forward(zb, w1, b1, w2, b2, seq_len)
    assert out_b.shape == (big_b, seq_len, feat_dim)
    assert jnp.allclose(out_b, ref_b, atol=1e-5, rtol=1e-5)

    # Ragged batch: B=300 with tm=152 -> last grid step is a partial tile.
    rag_b = 300
    zr = jax.random.normal(jax.random.PRNGKey(2), (rag_b, latent_dim), jnp.float32)
    out_r = jax.block_until_ready(level_model_forward(zr, w1, b1, w2, b2, seq_len))
    ref_r = reference_forward(zr, w1, b1, w2, b2, seq_len)
    assert out_r.shape == (rag_b, seq_len, feat_dim)
    assert jnp.allclose(out_r, ref_r, atol=1e-5, rtol=1e-5)

    print("KERNEL_OK")
</pallas_src>

<mosaic_0001>
module attributes {stable_mosaic.version = 11 : i64} {
  func.func @level_model_kernel(%arg0: i32, %arg1: memref<2x16xf32, #tpu.memory_space<vmem>>, %arg2: memref<16x32xf32, #tpu.memory_space<vmem>>, %arg3: memref<1x32xf32, #tpu.memory_space<vmem>>, %arg4: memref<32x256xf32, #tpu.memory_space<vmem>>, %arg5: memref<1x256xf32, #tpu.memory_space<vmem>>, %arg6: memref<2x256xf32, #tpu.memory_space<vmem>>) attributes {dimension_semantics = [#tpu.dimension_semantics<parallel>], iteration_bounds = array<i64: 1>, scalar_prefetch = 0 : i64, scratch_operands = 0 : i64, tpu.core_type = #tpu.core_type<tc>, window_params = [{transform_indices = @transform_0, window_bounds = array<i64: 2, 16>}, {pipeline_mode = #tpu.pipeline_mode<synchronous>, transform_indices = @transform_1, window_bounds = array<i64: 16, 32>}, {pipeline_mode = #tpu.pipeline_mode<synchronous>, transform_indices = @transform_2, window_bounds = array<i64: 1, 32>}, {pipeline_mode = #tpu.pipeline_mode<synchronous>, transform_indices = @transform_3, window_bounds = array<i64: 32, 256>}, {pipeline_mode = #tpu.pipeline_mode<synchronous>, transform_indices = @transform_4, window_bounds = array<i64: 1, 256>}, {transform_indices = @transform_5, window_bounds = array<i64: 2, 256>}]} {
    %c0 = arith.constant 0 : index
    %c0_0 = arith.constant 0 : index
    %0 = vector.load %arg1[%c0, %c0_0] : memref<2x16xf32, #tpu.memory_space<vmem>>, vector<2x16xf32>
    %c0_1 = arith.constant 0 : index
    %c0_2 = arith.constant 0 : index
    %1 = vector.load %arg2[%c0_1, %c0_2] : memref<16x32xf32, #tpu.memory_space<vmem>>, vector<16x32xf32>
    %cst = arith.constant dense<0.000000e+00> : vector<2x32xf32>
    %2 = tpu.matmul %0, %1, %cst {dimension_numbers = #tpu.dot_dimension_numbers<[1], [0], [0], [1], [0, 0, 1, 1], [], []>} : vector<2x16xf32>, vector<16x32xf32>, vector<2x32xf32> -> vector<2x32xf32>
    %c0_3 = arith.constant 0 : index
    %c0_4 = arith.constant 0 : index
    %3 = vector.load %arg3[%c0_3, %c0_4] : memref<1x32xf32, #tpu.memory_space<vmem>>, vector<1x32xf32>
    %4 = vector.broadcast %3 : vector<1x32xf32> to vector<2x32xf32>
    %5 = arith.addf %2, %4 : vector<2x32xf32>
    %cst_5 = arith.constant 0.000000e+00 : f32
    %6 = vector.broadcast %cst_5 : f32 to vector<2x32xf32>
    %7 = arith.maximumf %5, %6 : vector<2x32xf32>
    %c0_6 = arith.constant 0 : index
    %c0_7 = arith.constant 0 : index
    %8 = vector.load %arg4[%c0_6, %c0_7] : memref<32x256xf32, #tpu.memory_space<vmem>>, vector<32x256xf32>
    %cst_8 = arith.constant dense<0.000000e+00> : vector<2x256xf32>
    %9 = tpu.matmul %7, %8, %cst_8 {dimension_numbers = #tpu.dot_dimension_numbers<[1], [0], [0], [1], [0, 0, 1, 1], [], []>} : vector<2x32xf32>, vector<32x256xf32>, vector<2x256xf32> -> vector<2x256xf32>
    %c0_9 = arith.constant 0 : index
    %c0_10 = arith.constant 0 : index
    %10 = vector.load %arg5[%c0_9, %c0_10] : memref<1x256xf32, #tpu.memory_space<vmem>>, vector<1x256xf32>
    %11 = vector.broadcast %10 : vector<1x256xf32> to vector<2x256xf32>
    %12 = arith.addf %9, %11 : vector<2x256xf32>
    %c0_11 = arith.constant 0 : index
    %c0_12 = arith.constant 0 : index
    %13 = vector.load %arg6[%c0_11, %c0_12] : memref<2x256xf32, #tpu.memory_space<vmem>>, vector<2x256xf32>
    tpu.vector_store %arg6[%c0_11, %c0_12], %12 {strides = array<i32>} : memref<2x256xf32, #tpu.memory_space<vmem>>, vector<2x256xf32>,
    return
  }
  func.func @transform_0(%arg0: i32) -> (i32, i32) {
    %c0_i32 = arith.constant 0 : i32
    %c0_i32_0 = arith.constant 0 : i32
    return %arg0, %c0_i32 : i32, i32
  }
  func.func @transform_1(%arg0: i32) -> (i32, i32) {
    %c0_i32 = arith.constant 0 : i32
    %c0_i32_0 = arith.constant 0 : i32
    %c0_i32_1 = arith.constant 0 : i32
    return %c0_i32, %c0_i32_0 : i32, i32
  }
  func.func @transform_2(%arg0: i32) -> (i32, i32) {
    %c0_i32 = arith.constant 0 : i32
    %c0_i32_0 = arith.constant 0 : i32
    %c0_i32_1 = arith.constant 0 : i32
    return %c0_i32, %c0_i32_0 : i32, i32
  }
  func.func @transform_3(%arg0: i32) -> (i32, i32) {
    %c0_i32 = arith.constant 0 : i32
    %c0_i32_0 = arith.constant 0 : i32
    %c0_i32_1 = arith.constant 0 : i32
    return %c0_i32, %c0_i32_0 : i32, i32
  }
  func.func @transform_4(%arg0: i32) -> (i32, i32) {
    %c0_i32 = arith.constant 0 : i32
    %c0_i32_0 = arith.constant 0 : i32
    %c0_i32_1 = arith.constant 0 : i32
    return %c0_i32, %c0_i32_0 : i32, i32
  }
  func.func @transform_5(%arg0: i32) -> (i32, i32) {
    %c0_i32 = arith.constant 0 : i32
    %c0_i32_0 = arith.constant 0 : i32
    return %arg0, %c0_i32 : i32, i32
  }
}

</mosaic_0001>

<bundles_post_ra>
// kernel: tpu_custom_call.1
= control target key start
LH: loop header
LB: loop body
LE: loop exit
PB: predicated region body
PF: predicated region fallthrough
CT: control target
= control target key end

     0   :  { %10 = vsyncpa [#allocation3], 0  ;;  %s436_s0 = inlined_call_operand.hbm [shape: f32[2,16], index: 0, kind: input, shape index: {}]   ;;  %s437_s1 = inlined_call_operand.hbm [shape: f32[16,32], index: 1, kind: input, shape index: {}]   ;;  %s438_s2 = inlined_call_operand.vmem [shape: f32[1,32], index: 2, kind: input, shape index: {}]   ;;  %s439_s3 = inlined_call_operand.hbm [shape: f32[32,256], index: 3, kind: input, shape index: {}]   ;;  %s440_s4 = inlined_call_operand.vmem [shape: f32[1,256], index: 4, kind: input, shape index: {}]   ;;  %s441_s5 = inlined_call_operand.hbm [shape: f32[2,256], index: 5, kind: output, shape index: {}]  }
   0x1   :  { %11 = vsyncpa [#allocation6], 0 }
   0x2   :  { %12 = vsyncpa [#allocation4], 0  ;;  %s378_s18 = smov [#allocation5]  }
   0x3   :  { %s28_s19 = sshll.u32 %s378_s18, 4  ;;  %s29_s19 = int_to_ptr.vmem [resolvable:$true] %s28_s19 }
   0x4   :  { %s300_s20 = scalar_lea.vmem %s29_s19, 256  ;;  %p305_p1 = scmp.lt.s32.totalorder %s29_s19, %s29_s19 }
   0x5   :  { %p301_p0 = scmp.ne.s32.totalorder %s29_s19, %s300_s20  ;;  %p306_p2 = scmp.lt.s32.totalorder %s300_s20, %s300_s20 }
   0x7   :  { %p307_p3 = por %p306_p2, %p305_p1 }
   0x9   :  { %p308_p4 = pnand %p307_p3, %p301_p0 }
   0xb   :  { %311 = shalt.err (!%p308_p4)
}
   0xc   :  { %s379_s21 = smov 128   ;;  %s380_s22 = smov 8  }
   0xd   :  { %34 = dma.hbm_to_vmem [thread:$0]  %s437_s1, 256, %s29_s19, [#allocation6], %s379_s21, %s379_s21, %s380_s22  }
   0xe   :  { %s381_s25 = smov [#allocation2]   ;;  %s382_s27 = smov [#allocation7]  }
   0xf   :  { %s19_s26 = sshll.u32 %s381_s25, 4  ;;  %s42_s28 = sshll.u32 %s382_s27, 4  ;;  %s20_s26 = int_to_ptr.vmem [resolvable:$true] %s19_s26  ;;  %s43_s28 = int_to_ptr.vmem [resolvable:$true] %s42_s28 }
  0x10   :  { %s320_s29 = scalar_lea.vmem %s20_s26, 32  ;;  %p325_p6 = scmp.lt.s32.totalorder %s20_s26, %s20_s26 }
  0x11   :  { %p321_p5 = scmp.ne.s32.totalorder %s20_s26, %s320_s29  ;;  %p326_p7 = scmp.lt.s32.totalorder %s320_s29, %s320_s29 }
  0x13   :  { %p327_p8 = por %p326_p7, %p325_p6 }
  0x15   :  { %p328_p9 = pnand %p327_p8, %p321_p5 }
  0x17   :  { %331 = shalt.err (!%p328_p9)
}
  0x18   :  { %22 = dma.hbm_to_vmem [thread:$0]  %s436_s0, 32, %s20_s26, [#allocation3]  }
  0x19   :  { %s340_s7 = scalar_lea.vmem %s43_s28, 1024  ;;  %p345_p11 = scmp.lt.s32.totalorder %s43_s28, %s43_s28 }
  0x1a   :  { %p341_p10 = scmp.ne.s32.totalorder %s43_s28, %s340_s7  ;;  %p346_p12 = scmp.lt.s32.totalorder %s340_s7, %s340_s7 }
  0x1c   :  { %p347_p13 = por %p346_p12, %p345_p11 }
  0x1e   :  { %p348_p0 = pnand %p347_p13, %p341_p10 }
  0x20   :  { %351 = shalt.err (!%p348_p0)
}
  0x21   :  { %s383_s1 = smov 256   ;;  %s384_s8 = smov 16  }
  0x22   :  { %48 = dma.hbm_to_vmem [thread:$0]  %s439_s3, 1024, %s43_s28, [#allocation6], %s383_s1, %s383_s1, %s384_s8  }
  0x23   :  { %372 = dma.done.wait [#allocation3], 32  }
  0x24   :  { %373 = vsyncadd [#allocation3], 4294967264 }
  0x25   :  { %374 = dma.done.wait [#allocation6], 1280  }
  0x26   :  { %375 = vsyncadd [#allocation6], 4294966016  ;;  %v385_v0 = vmov 0.0   ;;  %vm386_vm0 = vmmov 0   ;;  %v62_v1 = vld [vmem:[#allocation5 + $0x8] sm:$0xff]  ;;  %v61_v2 = vld [vmem:[#allocation5] sm:$0xff]  ;;  %v155_v17 = vlaneseq }
  0x27   :  { %275 = vmatprep.subr.mxu0 %v385_v0  ;;  %279 = vmatprep.mubr.msk.f32.mxu0 %vm386_vm0, %v385_v0  ;;  %v60_v3 = vld [vmem:[#allocation2] sm:$0x3]  ;;  %vm70_vm1 = vcmask 130048   ;;  %v152_v4 = vld [vmem:[#allocation7 + $0x38] sm:$0xff]  ;;  %v151_v5 = vld [vmem:[#allocation7 + $0x30] sm:$0xff]  ;;  %vm165_vm2 = vcmask 261120  }
  0x28   :  { %233 = vmatprep.mubr.f32.mxu1 %v385_v0  ;;  %276 = vmatpush3.msra.mxu0 %v62_v1  ;;  %v150_v6 = vld [vmem:[#allocation7 + $0x28] sm:$0xff]  ;;  %v149_v7 = vld [vmem:[#allocation7 + $0x20] sm:$0xff]  ;;  %v148_v8 = vld [vmem:[#allocation7 + $0x18] sm:$0xff]  ;;  %v156_v18 = vshrl.u32 %v155_v17, 7  ;;  %s387_s13 = smov [#allocation8]  }
  0x29   :  { %277 = vmatprep.subr.mxu0 %v385_v0  ;;  %193 = vmatprep.subr.mxu1 %v152_v4  ;;  %v147_v9 = vld [vmem:[#allocation7 + $0x10] sm:$0xff]  ;;  %v146_v10 = vld [vmem:[#allocation7 + $0x8] sm:$0xff]  ;;  %v145_v11 = vld [vmem:[#allocation7] sm:$0xff] }
  0x2a   :  { %278 = vmatpush3.msra.mxu0 %v61_v2  ;;  %194 = vmatpush1.msra.mxu1 %v151_v5  ;;  %v268_v12 = vld [vmem:[%s438_s2] ss:$0 sm:$0xff]  ;;  %v157_v19 = vsub.s32 0, %v156_v18  ;;  %v161_v20 = vsub.s32 1, %v156_v18  ;;  %s258_s2 = sshll.u32 %s387_s13, 4  ;;  %s259_s2 = int_to_ptr.vmem [resolvable:$true] %s258_s2 }
  0x2b   :  { %280 = vmatmul.mubr.msk.f32.vlgmr.msra.gmra.mxu0 %vm70_vm1, %v60_v3  ;;  %195 = vmatprep.subr.mxu1 %v150_v6  ;;  %v153_v21 = vld [vmem:[%s440_s4] sm:$0x3]  ;;  %s352_s14 = scalar_lea.vmem %s259_s2, 64  ;;  %p357_p2 = scmp.lt.s32.totalorder %s259_s2, %s259_s2 }
  0x2c   :  { %196 = vmatpush1.msra.mxu1 %v149_v7  ;;  %v158_v22 = vrot.slane %v153_v21, %v157_v19  ;;  %v162_v23 = vrot.slane %v153_v21, %v161_v20  ;;  %p353_p1 = scmp.ne.s32.totalorder %s259_s2, %s352_s14  ;;  %p358_p3 = scmp.lt.s32.totalorder %s352_s14, %s352_s14 }
  0x2d   :  { %197 = vmatprep.subr.mxu1 %v148_v8 }
  0x2e   :  { %198 = vmatpush1.msra.mxu1 %v147_v9  ;;  %p359_p4 = por %p358_p3, %p357_p2 }
  0x2f   :  { %199 = vmatprep.subr.mxu1 %v146_v10 }
  0x30   :  { %200 = vmatpush1.msra.mxu1 %v145_v11  ;;  %p360_p5 = pnand %p359_p4, %p353_p1 }
  0xeb   :  { %v140_v13 = vpop.f32.mrf.mxu0 }
  0xec   :  { %v141_v14 = vadd.f32 %v268_v12, %v140_v13 }
  0xed   :  { %v281_v15 = vpop.f32.mrf.mxu0 }
  0xee   :  { %v144_v16 = vmax.f32 %v141_v14, 0.0 }
  0xf0   :  { %270 = vmatmul.mubr.msk.f32.vlgmr.msra.gmra.mxu1 %vm165_vm2, %v144_v16 }
 0x1b0   :  { %v235_v24 = vpop.f32.mrf.mxu1 }
 0x1b1   :  { %v236_v26 = vadd.f32 %v235_v24, %v158_v22 }
 0x1b2   :  { %v237_v25 = vpop.f32.mrf.mxu1 }
 0x1b3   :  { %v238_v27 = vadd.f32 %v237_v25, %v162_v23 }
 0x1b5   :  { %v242_v28 = vcombine.low %v236_v26, %v238_v27 }
 0x1b7   :  { %271 = vst.sshfl [vmem:[#allocation8] sm:$0x33 pattern:$0x76325410] %v242_v28 }
 0x1b8   :  { %363 = shalt.err (!%p360_p5)
}
 0x1b9   :  { %261 = dma.vmem_to_hbm [thread:$0]  %s259_s2, 64, %s441_s5, [#allocation4]  }
 0x1ba   :  { %376 = dma.done.wait [#allocation4], 64  }
 0x1bb   :  { %377 = vsyncadd [#allocation4], 4294967232 }
 0x1bc   :  { %265 = vsyncpa [#allocation3], 1 }
 0x1bd   :  { %266 = vsyncpa [#allocation6], 1 }
 0x1be   :  { %267 = vsyncpa [#allocation4], 1 }

</bundles_post_ra>
